<compile_context>
chip_gen: v7x
topology: tpu7x:2x2x1
jax: 0.10.0
libtpu: 0.0.40
codegen_flags: <defaults>
</compile_context>

<pallas_src>
import functools

import jax
import jax.numpy as jnp
from jax import lax
from jax.experimental import pallas as pl
from jax.experimental.pallas import tpu as pltpu

EPSILON = 1e-8


def _mape_partial_kernel(outputs_ref, targets_ref, scale_ref, abs_scale_ref,
                         mean_ref, red_ref, partial_ref, *,
                         epsilon, batch, block_rows, chunk_rows):
    """Writes sum_{rows in tile, c} (sum_t |diff|) / (||t||_2 + eps) for this tile."""
    d = scale_ref.shape[1]
    tile_row0 = pl.program_id(0) * block_rows

    # Hoisted out of the chunk loop (broadcast_in_dim is not CSE'd per iter).
    scale_b = jnp.broadcast_to(scale_ref[...], (chunk_rows, d))        # f32
    abs_scale_b = jnp.broadcast_to(abs_scale_ref[...], (chunk_rows, d))
    mean_b = jnp.broadcast_to(mean_ref[...], (chunk_rows, d))
    red = red_ref[...]                      # (D, C) 0/1 "sum over T" matrix

    def chunk_body(ci, acc):
        r = pl.multiple_of(ci * chunk_rows, chunk_rows)
        o = outputs_ref[pl.ds(r, chunk_rows), :].astype(jnp.float32)   # (rc, D)
        x = targets_ref[pl.ds(r, chunk_rows), :].astype(jnp.float32)   # (rc, D)

        # |t - o| = |targets - outputs| * |scale|  (the +mean cancels; exact).
        diff = jnp.abs(x - o) * abs_scale_b                            # (rc, D)
        t = x * scale_b + mean_b                                       # (rc, D)

        # Reduce over T (the stride-C lane positions) via the MXU; HIGHEST
        # precision => exact f32 accumulation, MXU is otherwise idle here.
        diff_sum = jnp.dot(diff, red, precision=lax.Precision.HIGHEST,
                           preferred_element_type=jnp.float32)         # (rc, C)
        norm_sq = jnp.dot(t * t, red, precision=lax.Precision.HIGHEST,
                          preferred_element_type=jnp.float32)          # (rc, C)

        q = diff_sum / (jnp.sqrt(norm_sq) + epsilon)                   # (rc, C)

        # Mask rows past the true batch size (ragged last tile reads padding).
        rows = tile_row0 + r + lax.broadcasted_iota(jnp.int32, (chunk_rows, 1), 0)
        q = jnp.where(rows < batch, q, 0.0)
        return acc + jnp.sum(q)

    num_chunks = block_rows // chunk_rows
    total = lax.fori_loop(0, num_chunks, chunk_body, jnp.float32(0.0))
    partial_ref[0, 0] = total


def _round_down(x: int, m: int) -> int:
    return (x // m) * m


def _vmem_capacity_bytes() -> int:
    try:
        return int(pltpu.get_tpu_info().vmem_capacity_bytes)
    except Exception:
        return 64 * 1024 * 1024   # conservative fallback (v7x physical VMEM)


def mape_loss(outputs, targets, scale_vec, mean_vec, *, epsilon=EPSILON):
    """outputs/targets: (B, T, C); scale_vec/mean_vec: (T*C,) like scaler.scale_/mean_."""
    B, T, C = outputs.shape
    D = T * C

    # Free reshape: all element-wise math runs lane-dense on the D = T*C axis
    # (C alone may be much smaller than the 128-lane vreg width).
    out2 = outputs.reshape(B, D)
    tgt2 = targets.reshape(B, D)

    scale_row = jnp.asarray(scale_vec, jnp.float32).reshape(1, D)
    mean_row = jnp.asarray(mean_vec, jnp.float32).reshape(1, D)
    abs_scale_row = jnp.abs(scale_row)
    # 0/1 matrix that sums the T positions belonging to each channel c (d % C == c).
    red_mat = ((jnp.arange(D, dtype=jnp.int32) % C)[:, None]
               == jnp.arange(C, dtype=jnp.int32)[None, :]).astype(jnp.float32)

    # ---- VMEM-aware tile sizing (padded bytes, not logical bytes) ----
    itemsize = jnp.dtype(outputs.dtype).itemsize
    packing = max(1, 4 // itemsize)
    sublane_mult = 8 * packing                       # 8 f32 / 16 bf16 / 32 int8
    lanes_padded = pl.cdiv(D, 128) * 128
    row_bytes_in = lanes_padded * itemsize           # one padded input row
    row_bytes_f32 = lanes_padded * 4                 # one padded f32 temp row

    vmem_cap = _vmem_capacity_bytes()
    # ~48 MiB on v7x (64 MiB physical), 96 MiB on v5e/v6e (128 MiB physical).
    vmem_limit = min((vmem_cap * 3) // 4, 96 * 1024 * 1024)
    vmem_budget = (vmem_limit * 9) // 10             # headroom for compiler scratch

    # In-kernel row chunk bounds each live f32 temporary to ~0.5 MiB.
    chunk_rows = max(sublane_mult,
                     _round_down((512 * 1024) // row_bytes_f32, sublane_mult))
    resident_bytes = (3 * 8 * lanes_padded * 4
                      + (pl.cdiv(D, 8) * 8) * (pl.cdiv(C, 128) * 128) * 4)
    temp_bytes = 10 * chunk_rows * row_bytes_f32     # o, x, diff, t, t*t, q, broadcasts
    # 2 inputs x 2 pipeline buffers of (bt, D) blocks must fit in what is left.
    avail = max(0, vmem_budget - resident_bytes - temp_bytes)
    block_bytes = min(16 * 1024 * 1024, avail // 4)  # 8-16 MiB blocks
    rows_budget = max(sublane_mult, block_bytes // row_bytes_in)

    # Keep >= ~4 tiles when possible so both v7x TensorCores get work.
    bt = min(B, rows_budget, max(pl.cdiv(B, 4), sublane_mult))
    if bt < B:
        bt = max(sublane_mult, _round_down(bt, sublane_mult))
        if bt >= B:
            bt = B
    if bt % sublane_mult == 0:
        chunk_rows = min(chunk_rows, bt)
        bt = _round_down(bt, chunk_rows)             # bt is a multiple of chunk_rows
    else:                                            # bt == B: small unaligned full block
        chunk_rows = bt
    num_tiles = pl.cdiv(B, bt)

    kernel = functools.partial(_mape_partial_kernel, epsilon=epsilon, batch=B,
                               block_rows=bt, chunk_rows=chunk_rows)

    cost = pl.CostEstimate(
        flops=int(8 * B * D + 4 * B * D * C),
        transcendentals=int(B * C),
        bytes_accessed=int(2 * B * D * itemsize + (3 * D + D * C) * 4 + num_tiles * 4),
    )

    partials = pl.pallas_call(
        kernel,
        out_shape=jax.ShapeDtypeStruct((num_tiles, 1), jnp.float32),
        grid_spec=pltpu.PrefetchScalarGridSpec(
            num_scalar_prefetch=0,
            grid=(num_tiles,),
            in_specs=[
                pl.BlockSpec((bt, D), lambda i: (i, 0)),   # outputs tile (native dtype)
                pl.BlockSpec((bt, D), lambda i: (i, 0)),   # targets tile (native dtype)
                pl.BlockSpec((1, D), lambda i: (0, 0)),    # scale        (resident)
                pl.BlockSpec((1, D), lambda i: (0, 0)),    # |scale|      (resident)
                pl.BlockSpec((1, D), lambda i: (0, 0)),    # mean         (resident)
                pl.BlockSpec((D, C), lambda i: (0, 0)),    # T-sum matrix (resident)
            ],
            out_specs=pl.BlockSpec(
                (1, 1), lambda i: (i, 0), memory_space=pltpu.MemorySpace.SMEM),
        ),
        compiler_params=pltpu.CompilerParams(
            dimension_semantics=("parallel",),
            vmem_limit_bytes=int(vmem_limit),
        ),
        cost_estimate=cost,
    )(out2, tgt2, scale_row, abs_scale_row, mean_row, red_mat)

    # Scalar finalize outside the kernel so the batch grid axis stays "parallel".
    return jnp.sum(partials) * (100.0 / (B * T * C))


def _mape_loss_ref(outputs, targets, scale_vec, mean_vec, epsilon=EPSILON):
    """Pure-JAX reference matching the PyTorch module exactly."""
    B, T, C = outputs.shape
    o = outputs.reshape(B, T * C).astype(jnp.float32) * scale_vec + mean_vec
    t = targets.reshape(B, T * C).astype(jnp.float32) * scale_vec + mean_vec
    o = o.reshape(B, T, C)
    t = t.reshape(B, T, C)
    diff = jnp.abs(t - o)
    norm = jnp.sqrt(jnp.sum(t * t, axis=1, keepdims=True))
    ape = diff / (norm + epsilon)
    return jnp.mean(ape) * 100.0


if __name__ == "__main__":
    key = jax.random.PRNGKey(0)

    # Small demo shape consistent with the module.
    B, T, C = 2, 8, 4
    k1, k2, k3, k4 = jax.random.split(key, 4)
    outputs = jax.random.normal(k1, (B, T, C), dtype=jnp.float32)
    targets = jax.random.normal(k2, (B, T, C), dtype=jnp.float32)
    scale_vec = jax.random.uniform(k3, (T * C,), minval=0.5, maxval=2.0, dtype=jnp.float32)
    mean_vec = jax.random.normal(k4, (T * C,), dtype=jnp.float32)

    loss = mape_loss(outputs, targets, scale_vec, mean_vec)
    jax.block_until_ready(loss)
    ref = _mape_loss_ref(outputs, targets, scale_vec, mean_vec)
    assert jnp.allclose(loss, ref, rtol=1e-4, atol=1e-5), (loss, ref)

    # Second check: ragged batch (B not a multiple of the tile) + bf16 inputs,
    # exercising the masked last tile and native-dtype DMA path.
    B2 = 37
    k5, k6 = jax.random.split(k4)
    outputs2 = jax.random.normal(k5, (B2, T, C), dtype=jnp.bfloat16)
    targets2 = jax.random.normal(k6, (B2, T, C), dtype=jnp.bfloat16)
    loss2 = mape_loss(outputs2, targets2, scale_vec, mean_vec)
    jax.block_until_ready(loss2)
    ref2 = _mape_loss_ref(outputs2, targets2, scale_vec, mean_vec)
    assert jnp.allclose(loss2, ref2, rtol=1e-4, atol=1e-5), (loss2, ref2)

    print("KERNEL_OK")
</pallas_src>

<mosaic_0001>
module attributes {stable_mosaic.version = 11 : i64} {
  func.func @_mape_partial_kernel(%arg0: i32, %arg1: memref<2x32xf32, #tpu.memory_space<vmem>>, %arg2: memref<2x32xf32, #tpu.memory_space<vmem>>, %arg3: memref<1x32xf32, #tpu.memory_space<vmem>>, %arg4: memref<1x32xf32, #tpu.memory_space<vmem>>, %arg5: memref<1x32xf32, #tpu.memory_space<vmem>>, %arg6: memref<32x4xf32, #tpu.memory_space<vmem>>, %arg7: memref<1x1xf32, #tpu.memory_space<smem>>) attributes {dimension_semantics = [#tpu.dimension_semantics<parallel>], iteration_bounds = array<i64: 1>, scalar_prefetch = 0 : i64, scratch_operands = 0 : i64, tpu.core_type = #tpu.core_type<tc>, window_params = [{transform_indices = @transform_0, window_bounds = array<i64: 2, 32>}, {transform_indices = @transform_1, window_bounds = array<i64: 2, 32>}, {pipeline_mode = #tpu.pipeline_mode<synchronous>, transform_indices = @transform_2, window_bounds = array<i64: 1, 32>}, {pipeline_mode = #tpu.pipeline_mode<synchronous>, transform_indices = @transform_3, window_bounds = array<i64: 1, 32>}, {pipeline_mode = #tpu.pipeline_mode<synchronous>, transform_indices = @transform_4, window_bounds = array<i64: 1, 32>}, {pipeline_mode = #tpu.pipeline_mode<synchronous>, transform_indices = @transform_5, window_bounds = array<i64: 32, 4>}, {transform_indices = @transform_6, window_bounds = array<i64: 1, 1>}]} {
    %c2_i32 = arith.constant 2 : i32
    %0 = arith.muli %arg0, %c2_i32 : i32
    %c0 = arith.constant 0 : index
    %c0_0 = arith.constant 0 : index
    %1 = vector.load %arg3[%c0, %c0_0] : memref<1x32xf32, #tpu.memory_space<vmem>>, vector<1x32xf32>
    %2 = vector.shape_cast %1 : vector<1x32xf32> to vector<1x32xf32>
    %3 = vector.broadcast %2 : vector<1x32xf32> to vector<2x32xf32>
    %c0_1 = arith.constant 0 : index
    %c0_2 = arith.constant 0 : index
    %4 = vector.load %arg4[%c0_1, %c0_2] : memref<1x32xf32, #tpu.memory_space<vmem>>, vector<1x32xf32>
    %5 = vector.shape_cast %4 : vector<1x32xf32> to vector<1x32xf32>
    %6 = vector.broadcast %5 : vector<1x32xf32> to vector<2x32xf32>
    %c0_3 = arith.constant 0 : index
    %c0_4 = arith.constant 0 : index
    %7 = vector.load %arg5[%c0_3, %c0_4] : memref<1x32xf32, #tpu.memory_space<vmem>>, vector<1x32xf32>
    %8 = vector.shape_cast %7 : vector<1x32xf32> to vector<1x32xf32>
    %9 = vector.broadcast %8 : vector<1x32xf32> to vector<2x32xf32>
    %c0_5 = arith.constant 0 : index
    %c0_6 = arith.constant 0 : index
    %10 = vector.load %arg6[%c0_5, %c0_6] : memref<32x4xf32, #tpu.memory_space<vmem>>, vector<32x4xf32>
    %cst = arith.constant 0.000000e+00 : f32
    %c0_i32 = arith.constant 0 : i32
    %c2_i32_7 = arith.constant 2 : i32
    %11 = arith.muli %c0_i32, %c2_i32_7 : i32
    %12 = tpu.assume_multiple %11, 2 : i32
    %13 = arith.index_cast %12 : i32 to index
    %c0_8 = arith.constant 0 : index
    %14 = vector.load %arg1[%13, %c0_8] : memref<2x32xf32, #tpu.memory_space<vmem>>, vector<2x32xf32>
    %15 = arith.index_cast %12 : i32 to index
    %c0_9 = arith.constant 0 : index
    %16 = vector.load %arg2[%15, %c0_9] : memref<2x32xf32, #tpu.memory_space<vmem>>, vector<2x32xf32>
    %17 = arith.subf %16, %14 : vector<2x32xf32>
    %18 = math.absf %17 : vector<2x32xf32>
    %19 = arith.mulf %18, %6 : vector<2x32xf32>
    %20 = arith.mulf %16, %3 : vector<2x32xf32>
    %21 = arith.addf %20, %9 : vector<2x32xf32>
    %cst_10 = arith.constant dense<0.000000e+00> : vector<2x4xf32>
    %22 = tpu.matmul %19, %10, %cst_10 {dimension_numbers = #tpu.dot_dimension_numbers<[1], [0], [0], [1], [0, 0, 1, 1], [], []>, precision = #tpu.contract_precision<fp32>} : vector<2x32xf32>, vector<32x4xf32>, vector<2x4xf32> -> vector<2x4xf32>
    %23 = arith.mulf %21, %21 : vector<2x32xf32>
    %cst_11 = arith.constant dense<0.000000e+00> : vector<2x4xf32>
    %24 = tpu.matmul %23, %10, %cst_11 {dimension_numbers = #tpu.dot_dimension_numbers<[1], [0], [0], [1], [0, 0, 1, 1], [], []>, precision = #tpu.contract_precision<fp32>} : vector<2x32xf32>, vector<32x4xf32>, vector<2x4xf32> -> vector<2x4xf32>
    %25 = math.sqrt %24 : vector<2x4xf32>
    %cst_12 = arith.constant 9.99999993E-9 : f32
    %26 = vector.broadcast %cst_12 : f32 to vector<2x4xf32>
    %27 = arith.addf %25, %26 : vector<2x4xf32>
    %28 = arith.divf %22, %27 : vector<2x4xf32>
    %29 = arith.addi %0, %12 : i32
    %30 = tpu.iota {dimensions = array<i32: 0>} : vector<2x1xi32>
    %31 = vector.broadcast %29 : i32 to vector<2x1xi32>
    %32 = arith.addi %31, %30 : vector<2x1xi32>
    %c2_i32_13 = arith.constant 2 : i32
    %33 = vector.broadcast %c2_i32_13 : i32 to vector<2x1xi32>
    %34 = arith.cmpi slt, %32, %33 : vector<2x1xi32>
    %cst_14 = arith.constant 0.000000e+00 : f32
    %35 = vector.shape_cast %34 : vector<2x1xi1> to vector<2x1xi1>
    %36 = vector.broadcast %35 : vector<2x1xi1> to vector<2x4xi1>
    %37 = vector.broadcast %cst_14 : f32 to vector<2x4xf32>
    %38 = arith.select %36, %28, %37 : vector<2x4xi1>, vector<2x4xf32>
    %39 = vector.shape_cast %38 : vector<2x4xf32> to vector<1x2x4xf32>
    %cst_15 = arith.constant dense<0.000000e+00> : vector<1xf32>
    %40 = vector.multi_reduction <add>, %39, %cst_15 [1, 2] : vector<1x2x4xf32> to vector<1xf32>
    %41 = vector.shape_cast %40 : vector<1xf32> to vector<1x1x1xf32>
    %42 = vector.extract %41[0, 0, 0] : f32 from vector<1x1x1xf32>
    %43 = arith.addf %cst, %42 : f32
    %c1_i32 = arith.constant 1 : i32
    %c0_16 = arith.constant 0 : index
    %c0_17 = arith.constant 0 : index
    %44 = memref.load %arg7[%c0_16, %c0_17] : memref<1x1xf32, #tpu.memory_space<smem>>
    memref.store %43, %arg7[%c0_16, %c0_17] : memref<1x1xf32, #tpu.memory_space<smem>>
    return
  }
  func.func @transform_0(%arg0: i32) -> (i32, i32) {
    %c0_i32 = arith.constant 0 : i32
    %c0_i32_0 = arith.constant 0 : i32
    return %arg0, %c0_i32 : i32, i32
  }
  func.func @transform_1(%arg0: i32) -> (i32, i32) {
    %c0_i32 = arith.constant 0 : i32
    %c0_i32_0 = arith.constant 0 : i32
    return %arg0, %c0_i32 : i32, i32
  }
  func.func @transform_2(%arg0: i32) -> (i32, i32) {
    %c0_i32 = arith.constant 0 : i32
    %c0_i32_0 = arith.constant 0 : i32
    %c0_i32_1 = arith.constant 0 : i32
    return %c0_i32, %c0_i32_0 : i32, i32
  }
  func.func @transform_3(%arg0: i32) -> (i32, i32) {
    %c0_i32 = arith.constant 0 : i32
    %c0_i32_0 = arith.constant 0 : i32
    %c0_i32_1 = arith.constant 0 : i32
    return %c0_i32, %c0_i32_0 : i32, i32
  }
  func.func @transform_4(%arg0: i32) -> (i32, i32) {
    %c0_i32 = arith.constant 0 : i32
    %c0_i32_0 = arith.constant 0 : i32
    %c0_i32_1 = arith.constant 0 : i32
    return %c0_i32, %c0_i32_0 : i32, i32
  }
  func.func @transform_5(%arg0: i32) -> (i32, i32) {
    %c0_i32 = arith.constant 0 : i32
    %c0_i32_0 = arith.constant 0 : i32
    %c0_i32_1 = arith.constant 0 : i32
    return %c0_i32, %c0_i32_0 : i32, i32
  }
  func.func @transform_6(%arg0: i32) -> (i32, i32) {
    %c0_i32 = arith.constant 0 : i32
    %c0_i32_0 = arith.constant 0 : i32
    return %arg0, %c0_i32 : i32, i32
  }
}

</mosaic_0001>

<bundles_post_ra>
// kernel: tpu_custom_call.1
= control target key start
LH: loop header
LB: loop body
LE: loop exit
PB: predicated region body
PF: predicated region fallthrough
CT: control target
= control target key end

     0   :  { %v1390_v3 = vmov 0.0|0.0   ;;  %vm1391_vm0 = vmmov 0   ;;  %v1392_v9 = vmov 0.0   ;;  %s1580_s0 = inlined_call_operand.vmem [shape: f32[2,32], index: 0, kind: input, shape index: {}]   ;;  %s1581_s1 = inlined_call_operand.vmem [shape: f32[2,32], index: 1, kind: input, shape index: {}]   ;;  %s1582_s2 = inlined_call_operand.vmem [shape: f32[1,32], index: 2, kind: input, shape index: {}]   ;;  %s1583_s3 = inlined_call_operand.vmem [shape: f32[1,32], index: 3, kind: input, shape index: {}]   ;;  %s1584_s4 = inlined_call_operand.vmem [shape: f32[1,32], index: 4, kind: input, shape index: {}]   ;;  %s1585_s5 = inlined_call_operand.vmem [shape: f32[32,4], index: 5, kind: input, shape index: {}]   ;;  %s1586_s6 = inlined_call_operand.hbm [shape: f32[1,1], index: 6, kind: output, shape index: {}]  }
   0x1   :  { %v46_v0 = vld [vmem:[%s1585_s5] sm:$0xff]  ;;  %v47_v1 = vld [vmem:[%s1585_s5 + $0x8] sm:$0xff]  ;;  %v48_v2 = vld [vmem:[%s1585_s5 + $0x10] sm:$0xff]  ;;  %1312 = vmatprep.subr.bf16.mxu1 %v1390_v3  ;;  %1276 = vmatprep.subr.bf16.mxu0 %v1390_v3 }
   0x2   :  { %v62_v4 = vand.u32 4294901760, %v46_v0  ;;  %v65_v5 = vand.u32 4294901760, %v47_v1  ;;  %v49_v6 = vld [vmem:[%s1585_s5 + $0x18] sm:$0xff]  ;;  %v68_v7 = vand.u32 4294901760, %v48_v2  ;;  %1152 = vmatprep.mubr.msk.f32.mxu0 %vm1391_vm0, %v1392_v9  ;;  %1218 = vmatprep.mubr.msk.f32.mxu1 %vm1391_vm0, %v1392_v9  ;;  %v50_v10 = vld [vmem:[%s1580_s0] sm:$0x3] }
   0x3   :  { %v71_v8 = vand.u32 4294901760, %v49_v6  ;;  %v51_v11 = vld [vmem:[%s1581_s1] sm:$0x3] }
   0x4   :  { %v1453_v12 = vpack.c.bf16 %v65_v5, %v62_v4  ;;  %v52_v13 = vsub.f32 %v51_v11, %v50_v10  ;;  %v1081_v14 = vld [vmem:[%s1582_s2] ss:$0 sm:$0xff]  ;;  %v1461_v16 = vsub.f32 %v46_v0, %v62_v4  ;;  %v1463_v17 = vsub.f32 %v47_v1, %v65_v5 }
   0x5   :  { %v1083_v15 = vld [vmem:[%s1584_s4] ss:$0 sm:$0xff] }
   0x6   :  { %11 = vsyncpa [#allocation3], 0  ;;  %v1465_v18 = vpack.c.bf16 %v71_v8, %v68_v7  ;;  %v1082_v19 = vld [vmem:[%s1583_s3] ss:$0 sm:$0xff]  ;;  %v55_v20 = vmul.f32 %v1081_v14, %v51_v11  ;;  %v1470_v21 = vsub.f32 %v48_v2, %v68_v7  ;;  %1314 = vmatpush3.bf16.msra.mxu1 %v1453_v12  ;;  %1278 = vmatpush3.bf16.msra.mxu0 %v1453_v12  ;;  %v53_v22 = vand.u32 2147483647, %v52_v13 }
   0x7   :  { %v143_v23 = vand.u32 4294901760, %v1461_v16  ;;  %v150_v24 = vand.u32 4294901760, %v1463_v17  ;;  %v1476_v25 = vsub.f32 %v49_v6, %v71_v8  ;;  %1315 = vmatprep.subr.bf16.mxu1 %v1390_v3  ;;  %1279 = vmatprep.subr.bf16.mxu0 %v1390_v3  ;;  %vm57_vm1 = vcmask 261120   ;;  %s1378_s12 = scalar_lea.hbm %s1586_s6, 16 }
   0x8   :  { %v56_v26 = vadd.f32 %v1083_v15, %v55_v20  ;;  %v54_v27 = vmul.f32 %v1082_v19, %v53_v22  ;;  %v157_v29 = vand.u32 4294901760, %v1470_v21  ;;  %v1289_v53 = vpack.c.bf16 %v1463_v17, %v1461_v16  ;;  %p1379_p0 = scmp.ne.s32.totalorder %s1586_s6, %s1378_s12  ;;  %p1382_p1 = scmp.lt.u32.totalorder %s1378_s12, %s1586_s6 }
   0x9   :  { %v144_v31 = vsub.f32 %v1461_v16, %v143_v23  ;;  %v151_v32 = vsub.f32 %v1463_v17, %v150_v24  ;;  %v164_v33 = vand.u32 4294901760, %v1476_v25  ;;  %v1292_v54 = vpack.c.bf16 %v1476_v25, %v1470_v21 }
   0xa   :  { %v546_v28 = vmul.f32 %v56_v26, %v56_v26  ;;  %1317 = vmatpush3.bf16.msra.mxu1 %v1465_v18  ;;  %1281 = vmatpush3.bf16.msra.mxu0 %v1465_v18  ;;  %v59_v30 = vsel %vm57_vm1, %v54_v27, 0  ;;  %v158_v38 = vsub.f32 %v1470_v21, %v157_v29  ;;  %v1301_v55 = vpack.c.bf16 %v150_v24, %v143_v23  ;;  %p1384_p2 = pnand %p1382_p1, %p1379_p0 }
   0xb   :  { %1318 = vmatprep.subr.bf16.mxu1 %v1390_v3  ;;  %v1491_v34 = vand.u32 4294901760, %v59_v30  ;;  %1282 = vmatprep.subr.bf16.mxu0 %v1390_v3  ;;  %v145_v40 = vand.u32 4294901760, %v144_v31  ;;  %v152_v41 = vand.u32 4294901760, %v151_v32  ;;  %v165_v42 = vsub.f32 %v1476_v25, %v164_v33 }
   0xc   :  { %v548_v35 = vsel %vm57_vm1, %v546_v28, 0  ;;  %v159_v48 = vand.u32 4294901760, %v158_v38  ;;  %v1304_v56 = vpack.c.bf16 %v164_v33, %v157_v29  ;;  %vm1054_vm5 = vcmask 25600  }
   0xd   :  { %v1494_v36 = vand.u32 4294901760, %v548_v35  ;;  %v131_v37 = vsub.f32 %v59_v30, %v1491_v34  ;;  %v1283_v47 = vpack.c.bf16 %v152_v41, %v145_v40  ;;  %v166_v49 = vand.u32 4294901760, %v165_v42 }
   0xf   :  { %v620_v39 = vsub.f32 %v548_v35, %v1494_v36  ;;  %v132_v43 = vand.u32 4294901760, %v131_v37  ;;  %v1286_v52 = vpack.c.bf16 %v166_v49, %v159_v48 }
  0x11   :  { %v621_v44 = vand.u32 4294901760, %v620_v39  ;;  %v133_v45 = vsub.f32 %v131_v37, %v132_v43 }
  0x13   :  { %v622_v46 = vsub.f32 %v620_v39, %v621_v44  ;;  %v134_v50 = vand.u32 4294901760, %v133_v45 }
  0x15   :  { %v623_v51 = vand.u32 4294901760, %v622_v46  ;;  %1153 = vmatmul.mubr.f32.vlgmr.msra.gmra.mrb[0].mxu0 %v134_v50 }
  0x16   :  { %1284 = vmatpush3.bf16.msra.mxu0 %v1283_v47  ;;  %1163 = vmatprep.mubr.msk.f32.mxu0 %vm1391_vm0, %v1392_v9 }
  0x17   :  { %1219 = vmatmul.mubr.f32.vlgmr.msra.gmra.mrb[0].mxu1 %v623_v51  ;;  %1285 = vmatprep.subr.bf16.mxu0 %v1390_v3 }
  0x18   :  { %1320 = vmatpush3.bf16.msra.mxu1 %v1283_v47  ;;  %1229 = vmatprep.mubr.msk.f32.mxu1 %vm1391_vm0, %v1392_v9 }
  0x19   :  { %1321 = vmatprep.subr.bf16.mxu1 %v1390_v3 }
  0x1a   :  { %1287 = vmatpush3.bf16.msra.mxu0 %v1286_v52 }
  0x1b   :  { %1288 = vmatprep.subr.bf16.mxu0 %v1390_v3 }
  0x1c   :  { %1323 = vmatpush3.bf16.msra.mxu1 %v1286_v52 }
  0x1d   :  { %1324 = vmatprep.subr.bf16.mxu1 %v1390_v3  ;;  %1164 = vmatmul.mubr.f32.vlgmr.msra.gmra.mrb[0].mxu0 %v1491_v34 }
  0x1e   :  { %1290 = vmatpush3.bf16.msra.mxu0 %v1289_v53  ;;  %1174 = vmatprep.mubr.msk.f32.mxu0 %vm1391_vm0, %v1392_v9 }
  0x1f   :  { %1230 = vmatmul.mubr.f32.vlgmr.msra.gmra.mrb[0].mxu1 %v1494_v36  ;;  %1291 = vmatprep.subr.bf16.mxu0 %v1390_v3 }
  0x20   :  { %1326 = vmatpush3.bf16.msra.mxu1 %v1289_v53  ;;  %1240 = vmatprep.mubr.msk.f32.mxu1 %vm1391_vm0, %v1392_v9 }
  0x21   :  { %1327 = vmatprep.subr.bf16.mxu1 %v1390_v3 }
  0x22   :  { %1293 = vmatpush3.bf16.msra.mxu0 %v1292_v54 }
  0x23   :  { %1294 = vmatprep.subr.bf16.mxu0 %v1390_v3 }
  0x24   :  { %1329 = vmatpush3.bf16.msra.mxu1 %v1292_v54 }
  0x25   :  { %1330 = vmatprep.subr.bf16.mxu1 %v1390_v3  ;;  %1175 = vmatmul.mubr.f32.vlgmr.msra.gmra.mrb[0].mxu0 %v131_v37 }
  0x26   :  { %1296 = vmatpush3.bf16.msra.mxu0 %v1453_v12  ;;  %1185 = vmatprep.mubr.msk.f32.mxu0 %vm1391_vm0, %v1392_v9 }
  0x27   :  { %1241 = vmatmul.mubr.f32.vlgmr.msra.gmra.mrb[0].mxu1 %v620_v39  ;;  %1297 = vmatprep.subr.bf16.mxu0 %v1390_v3 }
  0x28   :  { %1332 = vmatpush3.bf16.msra.mxu1 %v1453_v12  ;;  %1251 = vmatprep.mubr.msk.f32.mxu1 %vm1391_vm0, %v1392_v9 }
  0x29   :  { %1333 = vmatprep.subr.bf16.mxu1 %v1390_v3 }
  0x2a   :  { %1299 = vmatpush3.bf16.msra.mxu0 %v1465_v18 }
  0x2b   :  { %1300 = vmatprep.subr.bf16.mxu0 %v1390_v3 }
  0x2c   :  { %1335 = vmatpush3.bf16.msra.mxu1 %v1465_v18 }
  0x2d   :  { %1336 = vmatprep.subr.bf16.mxu1 %v1390_v3  ;;  %1186 = vmatmul.mubr.f32.vlgmr.msra.gmra.mrb[0].mxu0 %v132_v43 }
  0x2e   :  { %1302 = vmatpush3.bf16.msra.mxu0 %v1301_v55  ;;  %1196 = vmatprep.mubr.msk.f32.mxu0 %vm1391_vm0, %v1392_v9 }
  0x2f   :  { %1252 = vmatmul.mubr.f32.vlgmr.msra.gmra.mrb[0].mxu1 %v621_v44  ;;  %1303 = vmatprep.subr.bf16.mxu0 %v1390_v3 }
  0x30   :  { %1338 = vmatpush3.bf16.msra.mxu1 %v1301_v55  ;;  %1262 = vmatprep.mubr.msk.f32.mxu1 %vm1391_vm0, %v1392_v9 }
  0x31   :  { %1339 = vmatprep.subr.bf16.mxu1 %v1390_v3 }
  0x32   :  { %1305 = vmatpush3.bf16.msra.mxu0 %v1304_v56 }
  0x33   :  { %1306 = vmatprep.subr.bf16.mxu0 %v1390_v3 }
  0x34   :  { %1341 = vmatpush3.bf16.msra.mxu1 %v1304_v56 }
  0x35   :  { %1342 = vmatprep.subr.bf16.mxu1 %v1390_v3  ;;  %1197 = vmatmul.mubr.f32.vlgmr.msra.gmra.mrb[0].mxu0 %v1491_v34 }
  0x36   :  { %1308 = vmatpush3.bf16.msra.mxu0 %v1453_v12  ;;  %1207 = vmatprep.mubr.msk.f32.mxu0 %vm1391_vm0, %v1392_v9 }
  0x37   :  { %1263 = vmatmul.mubr.f32.vlgmr.msra.gmra.mrb[0].mxu1 %v1494_v36  ;;  %1309 = vmatprep.subr.bf16.mxu0 %v1390_v3 }
  0x38   :  { %1344 = vmatpush3.bf16.msra.mxu1 %v1453_v12  ;;  %1273 = vmatprep.mubr.msk.f32.mxu1 %vm1391_vm0, %v1392_v9 }
  0x39   :  { %1345 = vmatprep.subr.bf16.mxu1 %v1390_v3  ;;  %v1046_v3 = vlaneseq }
  0x3a   :  { %1311 = vmatpush3.bf16.msra.mxu0 %v1465_v18 }
  0x3b   :  { %v1047_v4 = vshrl.u32 %v1046_v3, 7 }
  0x3c   :  { %1347 = vmatpush3.bf16.msra.mxu1 %v1465_v18 }
  0x3d   :  { %1208 = vmatmul.mubr.f32.vlgmr.msra.gmra.mrb[0].mxu0 %v1491_v34  ;;  %vm1050_vm4 = vcmp.lt.s32.totalorder %v1047_v4, 2 }
  0x3f   :  { %1274 = vmatmul.mubr.f32.vlgmr.msra.gmra.mrb[0].mxu1 %v1494_v36 }
 0x110   :  { %v542_v57 = vpop.f32.mrb[0].mxu0 }
 0x111   :  { %v1209_v59 = vpop.f32.mrb[1].mxu0 }
 0x112   :  { %v1031_v58 = vpop.f32.mrb[0].mxu1 }
 0x113   :  { %1374 = vrsqrt.f32 %v1031_v58  ;;  %v1275_v60 = vpop.f32.mrb[1].mxu1  ;;  %vm1037_vm2 = vcmp.eq.f32.partialorder %v1031_v58, inf  ;;  %v1040_v63 = vand.u32 2147483648, %v1031_v58  ;;  %vm1039_vm3 = vcmp.eq.f32.partialorder %v1031_v58, 0.0 }
 0x11d   :  { %v1375_v61 = vpop.eup %1374 }
 0x11e   :  { %v1036_v62 = vmul.f32 %v1375_v61, %v1031_v58 }
 0x120   :  { %v1038_v0 = vsel %vm1037_vm2, %v1031_v58, %v1036_v62 }
 0x121   :  { %v1041_v1 = vsel %vm1039_vm3, %v1040_v63, %v1038_v0 }
 0x122   :  { %v1042_v2 = vadd.f32 1e-08, %v1041_v1 }
 0x124   :  { %1376 = vrcp.f32 %v1042_v2 }
 0x12e   :  { %v1377_v5 = vpop.eup %1376 }
 0x12f   :  { %v1044_v6 = vmul.f32 %v1377_v5, %v542_v57 }
 0x131   :  { %v1053_v7 = vsel %vm1050_vm4, %v1044_v6, 0.0 }
 0x132   :  { %v1055_v8 = vsel %vm1054_vm5, %v1053_v7, 0.0 }
 0x133   :  { %1056 = vadd.xlane.f32.xlu0 %v1055_v8 }
 0x1c0   :  { %v1057_v9 = vpop.xlane.xlu0 %1056 }
 0x1c1   :  { %v1058_v10 = vrot.slane %v1057_v9, 4 }
 0x1c3   :  { %v1059_v11 = vadd.f32 %v1058_v10, %v1057_v9 }
 0x1c5   :  { %v1060_v12 = vrot.slane %v1059_v11, 2 }
 0x1c7   :  { %v1061_v13 = vadd.f32 %v1060_v12, %v1059_v11 }
 0x1c9   :  { %v1062_v14 = vrot.slane %v1061_v13, 1 }
 0x1cb   :  { %v1063_v15 = vadd.f32 %v1062_v14, %v1061_v13 }
 0x1cd   :  { %1368 = vpush %v1063_v15 }
 0x1fe   :  { %s1369_s2 = spop %1368 }
 0x1ff   :  { %1067 = sst [smem:[#allocation2]] %s1369_s2 }
 0x200   :  { %1387 = shalt.err (!%p1384_p2)
}
 0x201   :  { %s1393_s17 = smov [#allocation2]  }
 0x202   :  { %1075 = dma.smem_to_hbm %s1393_s17, 16, %s1586_s6, [#allocation3]  }
 0x203   :  { %1388 = dma.done.wait [#allocation3], 16  }
 0x204   :  { %1389 = vsyncadd [#allocation3], 4294967280 }
 0x205   :  { %1079 = sfence }
 0x206   :  { %1080 = vsyncpa [#allocation3], 1 }

</bundles_post_ra>
